<compile_context>
chip_gen: v5e
topology: v5e:2x2
jax: 0.10.0
libtpu: 0.0.40
codegen_flags: <defaults>
</compile_context>

<pallas_src>
import jax
import jax.numpy as jnp
import numpy as np
from jax import lax
from jax.experimental import pallas as pl
from jax.experimental.pallas import tpu as pltpu


def _make_bottleneck_kernel(H, W, Cin, Cm, Cout, dilation, Nb):
    HW = H * W
    NHW = Nb * HW
    d = dilation
    # tap order (kh, kw) row-major -> matches im2col weight layout in wrapper
    offsets = [((kh - 1) * d, (kw - 1) * d) for kh in range(3) for kw in range(3)]

    def load_folded(ref):
        # (Nb, C, HW) block -> (C, Nb*HW) lane-dense slab (128-aligned concat).
        if Nb == 1:
            return ref[0]
        return jnp.concatenate([ref[i] for i in range(Nb)], axis=1)

    def kernel(x_ref, m_ref, w1_ref, b1_ref, w2_ref, b2_ref, w3_ref, b3_ref, o_ref):
        x = load_folded(x_ref)                                   # (Cin, NHW)

        # ---- conv1 (1x1, BN1 scale folded into w1) + shift + ReLU ----
        h1 = jnp.dot(w1_ref[...], x, preferred_element_type=jnp.float32)
        h1 = jnp.maximum(h1 + b1_ref[...], 0.0)                  # (Cm, NHW)

        # ---- conv2 (3x3, padding=dilation, stride=1) as 3 accumulated dots ----
        # Each group: 3 taps (lane rolls * precomputed per-image boundary masks)
        # concatenated along sublanes -> (3*Cm, NHW), one K=3*Cm MXU push.
        h2 = None
        for g in range(3):
            group = []
            for t in range(3 * g, 3 * g + 3):
                dh, dw = offsets[t]
                delta = dh * W + dw
                if delta == 0:
                    group.append(h1)                             # center tap, no mask
                else:
                    rolled = pltpu.roll(h1, shift=(-delta) % NHW, axis=1)
                    group.append(rolled * m_ref[t])              # (1, NHW) mask bcast
            slab = jnp.concatenate(group, axis=0)                # (3*Cm, NHW)
            part = jnp.dot(w2_ref[g], slab, preferred_element_type=jnp.float32)
            h2 = part if h2 is None else h2 + part
        h2 = jnp.maximum(h2 + b2_ref[...], 0.0)                  # (Cm, NHW)

        # ---- conv3 (1x1, BN3 scale folded) + shift + residual add + ReLU ----
        out = jnp.dot(w3_ref[...], h2, preferred_element_type=jnp.float32)
        res = load_folded(x_ref)                                 # re-read for residual
        out = jnp.maximum(out + b3_ref[...] + res, 0.0)          # (Cout, NHW)

        if Nb == 1:
            o_ref[0] = out.astype(o_ref.dtype)
        else:
            for i in range(Nb):
                o_ref[i] = out[:, i * HW:(i + 1) * HW].astype(o_ref.dtype)

    return kernel


def _make_tap_masks(H, W, Nb, dilation):
    """(9, 1, Nb*H*W) f32 validity masks for the 9 taps, per-image coords."""
    HW = H * W
    d = dilation
    hh, ww = np.meshgrid(np.arange(H), np.arange(W), indexing="ij")
    masks = []
    for kh in range(3):
        for kw in range(3):
            dh, dw = (kh - 1) * d, (kw - 1) * d
            m = ((hh + dh >= 0) & (hh + dh < H) &
                 (ww + dw >= 0) & (ww + dw < W))
            masks.append(m.reshape(HW))
    m = np.stack(masks, 0).astype(np.float32)        # (9, HW)
    m = np.tile(m, (1, Nb))                          # same mask for every image
    return jnp.asarray(m[:, None, :])                # (9, 1, Nb*HW)


def bottleneck_forward(x_nchw, params, dilation=1, blocks=1):
    """x_nchw: (N, Cin, H, W) float32 (native PyTorch layout).
    Identity residual path requires Cin == Cout == 4*output_.
    blocks: number of grid steps (use 2 on v7x to shard the batch across the
    two TensorCores; 1 on v5e/v6e)."""
    N, Cin, H, W = x_nchw.shape
    w1f, b1, w2g, b2, w3f, b3 = params
    Cm = w1f.shape[0]
    Cout = w3f.shape[0]
    HW = H * W
    assert Cin == Cout, "identity residual path requires Cin == 4*output_"
    assert HW % 128 == 0, "H*W must be a multiple of 128 for lane-dense blocks"
    assert N % blocks == 0, "batch must split evenly across grid blocks"
    Nb = N // blocks
    NHW = Nb * HW
    # TODO(synk): pad H*W to a multiple of 128 for odd spatial sizes.

    kernel = _make_bottleneck_kernel(H, W, Cin, Cm, Cout, dilation, Nb)
    x_flat = x_nchw.reshape(N, Cin, HW)          # free metadata reshape (contiguous)
    masks = _make_tap_masks(H, W, Nb, dilation)  # (9, 1, NHW) compile-time constants

    def const_spec(a):
        nd = a.ndim
        return pl.BlockSpec(a.shape, lambda b, _nd=nd: (0,) * _nd)

    flops = 2 * N * HW * (Cm * Cin + Cm * 9 * Cm + Cout * Cm)
    bytes_accessed = 4 * (x_flat.size + N * Cout * HW + masks.size
                          + w1f.size + b1.size + w2g.size + b2.size
                          + w3f.size + b3.size)
    cost = pl.CostEstimate(flops=int(flops), transcendentals=0,
                           bytes_accessed=int(bytes_accessed))

    out_flat = pl.pallas_call(
        kernel,
        out_shape=jax.ShapeDtypeStruct((N, Cout, HW), x_nchw.dtype),
        grid_spec=pltpu.PrefetchScalarGridSpec(
            num_scalar_prefetch=0,
            grid=(blocks,),
            in_specs=[
                pl.BlockSpec((Nb, Cin, HW), lambda b: (b, 0, 0)),
                const_spec(masks),
                const_spec(w1f), const_spec(b1),
                const_spec(w2g), const_spec(b2),
                const_spec(w3f), const_spec(b3),
            ],
            out_specs=pl.BlockSpec((Nb, Cout, HW), lambda b: (b, 0, 0)),
        ),
        compiler_params=pltpu.CompilerParams(
            dimension_semantics=("parallel",)),
        cost_estimate=cost,
    )(x_flat, masks, w1f, b1, w2g, b2, w3f, b3)
    return out_flat.reshape(N, Cout, H, W)


def _fold_bn(gamma, beta, mean, var, eps=1e-5):
    scale = gamma / jnp.sqrt(var + eps)
    shift = beta - mean * scale
    return scale, shift


def prepare_params(w1_t, w2_t, w3_t, bn1, bn2, bn3):
    """Fold BN scales into the conv weights; return kernel-ready operands.

    w*_t are PyTorch-layout (Cout, Cin, KH, KW); bn* are (scale, shift) 1-D."""
    s1, b1 = bn1
    s2, b2 = bn2
    s3, b3 = bn3
    Cm_out, Cm_in = w2_t.shape[0], w2_t.shape[1]
    Cm = w1_t.shape[0]
    Cout = w3_t.shape[0]

    w1f = (w1_t[:, :, 0, 0] * s1[:, None]).astype(jnp.float32)            # (Cm, Cin)
    # im2col weight: columns grouped by tap (kh, kw) row-major, Cm_in each,
    # then split into 3 groups of 3 taps for the accumulated-dot schedule.
    w2cat = jnp.transpose(w2_t, (0, 2, 3, 1)).reshape(Cm_out, 9 * Cm_in)
    w2f = (w2cat * s2[:, None]).astype(jnp.float32)                        # (Cm, 9*Cm)
    w2g = w2f.reshape(Cm_out, 3, 3 * Cm_in).transpose(1, 0, 2)             # (3, Cm, 3*Cm)
    w3f = (w3_t[:, :, 0, 0] * s3[:, None]).astype(jnp.float32)             # (Cout, Cm)

    return (w1f, b1.reshape(Cm, 1).astype(jnp.float32),
            w2g, b2.reshape(Cm_out, 1).astype(jnp.float32),
            w3f, b3.reshape(Cout, 1).astype(jnp.float32))


def _ref_forward(x_nchw, w1_t, w2_t, w3_t, bn1, bn2, bn3, dilation=1):
    """Pure-JAX reference (lax.conv, NCHW) for sanity checking."""
    d = dilation
    dn = ("NCHW", "OIHW", "NCHW")

    def bn(h, sb):
        s, b = sb
        return h * s.reshape(1, -1, 1, 1) + b.reshape(1, -1, 1, 1)

    h = lax.conv_general_dilated(x_nchw, w1_t, (1, 1), "VALID", dimension_numbers=dn)
    h = jnp.maximum(bn(h, bn1), 0.0)
    h = lax.conv_general_dilated(h, w2_t, (1, 1), [(d, d), (d, d)],
                                 rhs_dilation=(d, d), dimension_numbers=dn)
    h = jnp.maximum(bn(h, bn2), 0.0)
    h = lax.conv_general_dilated(h, w3_t, (1, 1), "VALID", dimension_numbers=dn)
    h = bn(h, bn3)
    return jnp.maximum(h + x_nchw, 0.0)


if __name__ == "__main__":
    # Bottleneck(input_=32, output_=8, stride=1, dilation=1, downsample=None)
    N, H, W = 2, 16, 16
    Cin, Cm = 32, 8
    Cout = Cm * 4          # == Cin so the identity residual add is valid
    dilation = 1

    key = jax.random.PRNGKey(0)
    ks = jax.random.split(key, 8)

    # PyTorch-layout conv weights (Cout, Cin, KH, KW).
    w1_t = 0.1 * jax.random.normal(ks[0], (Cm, Cin, 1, 1), jnp.float32)
    w2_t = 0.1 * jax.random.normal(ks[1], (Cm, Cm, 3, 3), jnp.float32)
    w3_t = 0.1 * jax.random.normal(ks[2], (Cout, Cm, 1, 1), jnp.float32)

    # BatchNorm (eval mode) parameters, folded to per-channel scale/shift.
    def bn_params(k, c):
        k1, k2, k3, k4 = jax.random.split(k, 4)
        gamma = 1.0 + 0.1 * jax.random.normal(k1, (c,), jnp.float32)
        beta = 0.1 * jax.random.normal(k2, (c,), jnp.float32)
        mean = 0.1 * jax.random.normal(k3, (c,), jnp.float32)
        var = jax.random.uniform(k4, (c,), jnp.float32, 0.5, 1.5)
        return _fold_bn(gamma, beta, mean, var)

    bn1 = bn_params(ks[3], Cm)
    bn2 = bn_params(ks[4], Cm)
    bn3 = bn_params(ks[5], Cout)

    params = prepare_params(w1_t, w2_t, w3_t, bn1, bn2, bn3)

    # Input in native PyTorch NCHW layout (no conversion needed for the kernel).
    x_nchw = jax.random.normal(ks[6], (N, Cin, H, W), jnp.float32)

    # blocks=1: whole batch folded into the lane axis, single grid step
    # (set blocks=2 on v7x to use both TensorCores).
    out = jax.block_until_ready(
        bottleneck_forward(x_nchw, params, dilation=dilation, blocks=1))
    ref = jax.block_until_ready(
        _ref_forward(x_nchw, w1_t, w2_t, w3_t, bn1, bn2, bn3, dilation=dilation))

    assert out.shape == (N, Cout, H, W)
    np.testing.assert_allclose(np.asarray(out), np.asarray(ref), rtol=1e-4, atol=1e-4)

    print("KERNEL_OK")
</pallas_src>

<mosaic_0001>
module attributes {stable_mosaic.version = 11 : i64} {
  func.func @kernel(%arg0: i32, %arg1: memref<2x32x256xf32, #tpu.memory_space<vmem>>, %arg2: memref<9x1x512xf32, #tpu.memory_space<vmem>>, %arg3: memref<8x32xf32, #tpu.memory_space<vmem>>, %arg4: memref<8x1xf32, #tpu.memory_space<vmem>>, %arg5: memref<3x8x24xf32, #tpu.memory_space<vmem>>, %arg6: memref<8x1xf32, #tpu.memory_space<vmem>>, %arg7: memref<32x8xf32, #tpu.memory_space<vmem>>, %arg8: memref<32x1xf32, #tpu.memory_space<vmem>>, %arg9: memref<2x32x256xf32, #tpu.memory_space<vmem>>) attributes {dimension_semantics = [#tpu.dimension_semantics<parallel>], iteration_bounds = array<i64: 1>, scalar_prefetch = 0 : i64, scratch_operands = 0 : i64, tpu.core_type = #tpu.core_type<tc>, window_params = [{transform_indices = @transform_0, window_bounds = array<i64: 2, 32, 256>}, {pipeline_mode = #tpu.pipeline_mode<synchronous>, transform_indices = @transform_1, window_bounds = array<i64: 9, 1, 512>}, {pipeline_mode = #tpu.pipeline_mode<synchronous>, transform_indices = @transform_2, window_bounds = array<i64: 8, 32>}, {pipeline_mode = #tpu.pipeline_mode<synchronous>, transform_indices = @transform_3, window_bounds = array<i64: 8, 1>}, {pipeline_mode = #tpu.pipeline_mode<synchronous>, transform_indices = @transform_4, window_bounds = array<i64: 3, 8, 24>}, {pipeline_mode = #tpu.pipeline_mode<synchronous>, transform_indices = @transform_5, window_bounds = array<i64: 8, 1>}, {pipeline_mode = #tpu.pipeline_mode<synchronous>, transform_indices = @transform_6, window_bounds = array<i64: 32, 8>}, {pipeline_mode = #tpu.pipeline_mode<synchronous>, transform_indices = @transform_7, window_bounds = array<i64: 32, 1>}, {transform_indices = @transform_8, window_bounds = array<i64: 2, 32, 256>}]} {
    %c0 = arith.constant 0 : index
    %c0_0 = arith.constant 0 : index
    %c0_1 = arith.constant 0 : index
    %0 = vector.load %arg1[%c0, %c0_0, %c0_1] : memref<2x32x256xf32, #tpu.memory_space<vmem>>, vector<1x32x256xf32>
    %1 = vector.shape_cast %0 : vector<1x32x256xf32> to vector<32x256xf32>
    %c1 = arith.constant 1 : index
    %c0_2 = arith.constant 0 : index
    %c0_3 = arith.constant 0 : index
    %2 = vector.load %arg1[%c1, %c0_2, %c0_3] : memref<2x32x256xf32, #tpu.memory_space<vmem>>, vector<1x32x256xf32>
    %3 = vector.shape_cast %2 : vector<1x32x256xf32> to vector<32x256xf32>
    %4 = tpu.concatenate %1, %3 in 1 : vector<32x256xf32>, vector<32x256xf32> -> vector<32x512xf32>
    %c0_4 = arith.constant 0 : index
    %c0_5 = arith.constant 0 : index
    %5 = vector.load %arg3[%c0_4, %c0_5] : memref<8x32xf32, #tpu.memory_space<vmem>>, vector<8x32xf32>
    %cst = arith.constant dense<0.000000e+00> : vector<8x512xf32>
    %6 = tpu.matmul %5, %4, %cst {dimension_numbers = #tpu.dot_dimension_numbers<[1], [0], [0], [1], [0, 0, 1, 1], [], []>} : vector<8x32xf32>, vector<32x512xf32>, vector<8x512xf32> -> vector<8x512xf32>
    %c0_6 = arith.constant 0 : index
    %c0_7 = arith.constant 0 : index
    %7 = vector.load %arg4[%c0_6, %c0_7] : memref<8x1xf32, #tpu.memory_space<vmem>>, vector<8x1xf32>
    %8 = vector.broadcast %7 : vector<8x1xf32> to vector<8x512xf32>
    %9 = arith.addf %6, %8 : vector<8x512xf32>
    %cst_8 = arith.constant 0.000000e+00 : f32
    %10 = vector.broadcast %cst_8 : f32 to vector<8x512xf32>
    %11 = arith.maximumf %9, %10 : vector<8x512xf32>
    %c17_i32 = arith.constant 17 : i32
    %12 = tpu.dynamic_rotate %11 by %c17_i32 dim 1 : vector<8x512xf32>, i32 -> vector<8x512xf32>
    %c0_9 = arith.constant 0 : index
    %c0_10 = arith.constant 0 : index
    %c0_11 = arith.constant 0 : index
    %13 = vector.load %arg2[%c0_9, %c0_10, %c0_11] : memref<9x1x512xf32, #tpu.memory_space<vmem>>, vector<1x1x512xf32>
    %14 = vector.shape_cast %13 : vector<1x1x512xf32> to vector<1x512xf32>
    %15 = vector.broadcast %14 : vector<1x512xf32> to vector<8x512xf32>
    %16 = arith.mulf %12, %15 : vector<8x512xf32>
    %c16_i32 = arith.constant 16 : i32
    %17 = tpu.dynamic_rotate %11 by %c16_i32 dim 1 : vector<8x512xf32>, i32 -> vector<8x512xf32>
    %c1_12 = arith.constant 1 : index
    %c0_13 = arith.constant 0 : index
    %c0_14 = arith.constant 0 : index
    %18 = vector.load %arg2[%c1_12, %c0_13, %c0_14] : memref<9x1x512xf32, #tpu.memory_space<vmem>>, vector<1x1x512xf32>
    %19 = vector.shape_cast %18 : vector<1x1x512xf32> to vector<1x512xf32>
    %20 = vector.broadcast %19 : vector<1x512xf32> to vector<8x512xf32>
    %21 = arith.mulf %17, %20 : vector<8x512xf32>
    %c15_i32 = arith.constant 15 : i32
    %22 = tpu.dynamic_rotate %11 by %c15_i32 dim 1 : vector<8x512xf32>, i32 -> vector<8x512xf32>
    %c2 = arith.constant 2 : index
    %c0_15 = arith.constant 0 : index
    %c0_16 = arith.constant 0 : index
    %23 = vector.load %arg2[%c2, %c0_15, %c0_16] : memref<9x1x512xf32, #tpu.memory_space<vmem>>, vector<1x1x512xf32>
    %24 = vector.shape_cast %23 : vector<1x1x512xf32> to vector<1x512xf32>
    %25 = vector.broadcast %24 : vector<1x512xf32> to vector<8x512xf32>
    %26 = arith.mulf %22, %25 : vector<8x512xf32>
    %27 = tpu.concatenate %16, %21, %26 in 0 : vector<8x512xf32>, vector<8x512xf32>, vector<8x512xf32> -> vector<24x512xf32>
    %c0_17 = arith.constant 0 : index
    %c0_18 = arith.constant 0 : index
    %c0_19 = arith.constant 0 : index
    %28 = vector.load %arg5[%c0_17, %c0_18, %c0_19] : memref<3x8x24xf32, #tpu.memory_space<vmem>>, vector<1x8x24xf32>
    %29 = vector.shape_cast %28 : vector<1x8x24xf32> to vector<8x24xf32>
    %cst_20 = arith.constant dense<0.000000e+00> : vector<8x512xf32>
    %30 = tpu.matmul %29, %27, %cst_20 {dimension_numbers = #tpu.dot_dimension_numbers<[1], [0], [0], [1], [0, 0, 1, 1], [], []>} : vector<8x24xf32>, vector<24x512xf32>, vector<8x512xf32> -> vector<8x512xf32>
    %c1_i32 = arith.constant 1 : i32
    %31 = tpu.dynamic_rotate %11 by %c1_i32 dim 1 : vector<8x512xf32>, i32 -> vector<8x512xf32>
    %c3 = arith.constant 3 : index
    %c0_21 = arith.constant 0 : index
    %c0_22 = arith.constant 0 : index
    %32 = vector.load %arg2[%c3, %c0_21, %c0_22] : memref<9x1x512xf32, #tpu.memory_space<vmem>>, vector<1x1x512xf32>
    %33 = vector.shape_cast %32 : vector<1x1x512xf32> to vector<1x512xf32>
    %34 = vector.broadcast %33 : vector<1x512xf32> to vector<8x512xf32>
    %35 = arith.mulf %31, %34 : vector<8x512xf32>
    %c511_i32 = arith.constant 511 : i32
    %36 = tpu.dynamic_rotate %11 by %c511_i32 dim 1 : vector<8x512xf32>, i32 -> vector<8x512xf32>
    %c5 = arith.constant 5 : index
    %c0_23 = arith.constant 0 : index
    %c0_24 = arith.constant 0 : index
    %37 = vector.load %arg2[%c5, %c0_23, %c0_24] : memref<9x1x512xf32, #tpu.memory_space<vmem>>, vector<1x1x512xf32>
    %38 = vector.shape_cast %37 : vector<1x1x512xf32> to vector<1x512xf32>
    %39 = vector.broadcast %38 : vector<1x512xf32> to vector<8x512xf32>
    %40 = arith.mulf %36, %39 : vector<8x512xf32>
    %41 = tpu.concatenate %35, %11, %40 in 0 : vector<8x512xf32>, vector<8x512xf32>, vector<8x512xf32> -> vector<24x512xf32>
    %c1_25 = arith.constant 1 : index
    %c0_26 = arith.constant 0 : index
    %c0_27 = arith.constant 0 : index
    %42 = vector.load %arg5[%c1_25, %c0_26, %c0_27] : memref<3x8x24xf32, #tpu.memory_space<vmem>>, vector<1x8x24xf32>
    %43 = vector.shape_cast %42 : vector<1x8x24xf32> to vector<8x24xf32>
    %cst_28 = arith.constant dense<0.000000e+00> : vector<8x512xf32>
    %44 = tpu.matmul %43, %41, %cst_28 {dimension_numbers = #tpu.dot_dimension_numbers<[1], [0], [0], [1], [0, 0, 1, 1], [], []>} : vector<8x24xf32>, vector<24x512xf32>, vector<8x512xf32> -> vector<8x512xf32>
    %45 = arith.addf %30, %44 : vector<8x512xf32>
    %c497_i32 = arith.constant 497 : i32
    %46 = tpu.dynamic_rotate %11 by %c497_i32 dim 1 : vector<8x512xf32>, i32 -> vector<8x512xf32>
    %c6 = arith.constant 6 : index
    %c0_29 = arith.constant 0 : index
    %c0_30 = arith.constant 0 : index
    %47 = vector.load %arg2[%c6, %c0_29, %c0_30] : memref<9x1x512xf32, #tpu.memory_space<vmem>>, vector<1x1x512xf32>
    %48 = vector.shape_cast %47 : vector<1x1x512xf32> to vector<1x512xf32>
    %49 = vector.broadcast %48 : vector<1x512xf32> to vector<8x512xf32>
    %50 = arith.mulf %46, %49 : vector<8x512xf32>
    %c496_i32 = arith.constant 496 : i32
    %51 = tpu.dynamic_rotate %11 by %c496_i32 dim 1 : vector<8x512xf32>, i32 -> vector<8x512xf32>
    %c7 = arith.constant 7 : index
    %c0_31 = arith.constant 0 : index
    %c0_32 = arith.constant 0 : index
    %52 = vector.load %arg2[%c7, %c0_31, %c0_32] : memref<9x1x512xf32, #tpu.memory_space<vmem>>, vector<1x1x512xf32>
    %53 = vector.shape_cast %52 : vector<1x1x512xf32> to vector<1x512xf32>
    %54 = vector.broadcast %53 : vector<1x512xf32> to vector<8x512xf32>
    %55 = arith.mulf %51, %54 : vector<8x512xf32>
    %c495_i32 = arith.constant 495 : i32
    %56 = tpu.dynamic_rotate %11 by %c495_i32 dim 1 : vector<8x512xf32>, i32 -> vector<8x512xf32>
    %c8 = arith.constant 8 : index
    %c0_33 = arith.constant 0 : index
    %c0_34 = arith.constant 0 : index
    %57 = vector.load %arg2[%c8, %c0_33, %c0_34] : memref<9x1x512xf32, #tpu.memory_space<vmem>>, vector<1x1x512xf32>
    %58 = vector.shape_cast %57 : vector<1x1x512xf32> to vector<1x512xf32>
    %59 = vector.broadcast %58 : vector<1x512xf32> to vector<8x512xf32>
    %60 = arith.mulf %56, %59 : vector<8x512xf32>
    %61 = tpu.concatenate %50, %55, %60 in 0 : vector<8x512xf32>, vector<8x512xf32>, vector<8x512xf32> -> vector<24x512xf32>
    %c2_35 = arith.constant 2 : index
    %c0_36 = arith.constant 0 : index
    %c0_37 = arith.constant 0 : index
    %62 = vector.load %arg5[%c2_35, %c0_36, %c0_37] : memref<3x8x24xf32, #tpu.memory_space<vmem>>, vector<1x8x24xf32>
    %63 = vector.shape_cast %62 : vector<1x8x24xf32> to vector<8x24xf32>
    %cst_38 = arith.constant dense<0.000000e+00> : vector<8x512xf32>
    %64 = tpu.matmul %63, %61, %cst_38 {dimension_numbers = #tpu.dot_dimension_numbers<[1], [0], [0], [1], [0, 0, 1, 1], [], []>} : vector<8x24xf32>, vector<24x512xf32>, vector<8x512xf32> -> vector<8x512xf32>
    %65 = arith.addf %45, %64 : vector<8x512xf32>
    %c0_39 = arith.constant 0 : index
    %c0_40 = arith.constant 0 : index
    %66 = vector.load %arg6[%c0_39, %c0_40] : memref<8x1xf32, #tpu.memory_space<vmem>>, vector<8x1xf32>
    %67 = vector.broadcast %66 : vector<8x1xf32> to vector<8x512xf32>
    %68 = arith.addf %65, %67 : vector<8x512xf32>
    %cst_41 = arith.constant 0.000000e+00 : f32
    %69 = vector.broadcast %cst_41 : f32 to vector<8x512xf32>
    %70 = arith.maximumf %68, %69 : vector<8x512xf32>
    %c0_42 = arith.constant 0 : index
    %c0_43 = arith.constant 0 : index
    %71 = vector.load %arg7[%c0_42, %c0_43] : memref<32x8xf32, #tpu.memory_space<vmem>>, vector<32x8xf32>
    %cst_44 = arith.constant dense<0.000000e+00> : vector<32x512xf32>
    %72 = tpu.matmul %71, %70, %cst_44 {dimension_numbers = #tpu.dot_dimension_numbers<[1], [0], [0], [1], [0, 0, 1, 1], [], []>} : vector<32x8xf32>, vector<8x512xf32>, vector<32x512xf32> -> vector<32x512xf32>
    %c0_45 = arith.constant 0 : index
    %c0_46 = arith.constant 0 : index
    %c0_47 = arith.constant 0 : index
    %73 = vector.load %arg1[%c0_45, %c0_46, %c0_47] : memref<2x32x256xf32, #tpu.memory_space<vmem>>, vector<1x32x256xf32>
    %74 = vector.shape_cast %73 : vector<1x32x256xf32> to vector<32x256xf32>
    %c1_48 = arith.constant 1 : index
    %c0_49 = arith.constant 0 : index
    %c0_50 = arith.constant 0 : index
    %75 = vector.load %arg1[%c1_48, %c0_49, %c0_50] : memref<2x32x256xf32, #tpu.memory_space<vmem>>, vector<1x32x256xf32>
    %76 = vector.shape_cast %75 : vector<1x32x256xf32> to vector<32x256xf32>
    %77 = tpu.concatenate %74, %76 in 1 : vector<32x256xf32>, vector<32x256xf32> -> vector<32x512xf32>
    %c0_51 = arith.constant 0 : index
    %c0_52 = arith.constant 0 : index
    %78 = vector.load %arg8[%c0_51, %c0_52] : memref<32x1xf32, #tpu.memory_space<vmem>>, vector<32x1xf32>
    %79 = vector.broadcast %78 : vector<32x1xf32> to vector<32x512xf32>
    %80 = arith.addf %72, %79 : vector<32x512xf32>
    %81 = arith.addf %80, %77 : vector<32x512xf32>
    %cst_53 = arith.constant 0.000000e+00 : f32
    %82 = vector.broadcast %cst_53 : f32 to vector<32x512xf32>
    %83 = arith.maximumf %81, %82 : vector<32x512xf32>
    %84 = vector.extract_strided_slice %83 {offsets = [0, 0], sizes = [32, 256], strides = [1, 1]} : vector<32x512xf32> to vector<32x256xf32>
    %c0_54 = arith.constant 0 : index
    %c0_55 = arith.constant 0 : index
    %c0_56 = arith.constant 0 : index
    %85 = vector.load %arg9[%c0_54, %c0_55, %c0_56] : memref<2x32x256xf32, #tpu.memory_space<vmem>>, vector<1x32x256xf32>
    %86 = vector.shape_cast %85 : vector<1x32x256xf32> to vector<32x256xf32>
    %87 = vector.shape_cast %84 : vector<32x256xf32> to vector<1x32x256xf32>
    tpu.vector_store %arg9[%c0_54, %c0_55, %c0_56], %87 {strides = array<i32>} : memref<2x32x256xf32, #tpu.memory_space<vmem>>, vector<1x32x256xf32>,
    %88 = vector.extract_strided_slice %83 {offsets = [0, 256], sizes = [32, 256], strides = [1, 1]} : vector<32x512xf32> to vector<32x256xf32>
    %c1_57 = arith.constant 1 : index
    %c0_58 = arith.constant 0 : index
    %c0_59 = arith.constant 0 : index
    %89 = vector.load %arg9[%c1_57, %c0_58, %c0_59] : memref<2x32x256xf32, #tpu.memory_space<vmem>>, vector<1x32x256xf32>
    %90 = vector.shape_cast %89 : vector<1x32x256xf32> to vector<32x256xf32>
    %91 = vector.shape_cast %88 : vector<32x256xf32> to vector<1x32x256xf32>
    tpu.vector_store %arg9[%c1_57, %c0_58, %c0_59], %91 {strides = array<i32>} : memref<2x32x256xf32, #tpu.memory_space<vmem>>, vector<1x32x256xf32>,
    return
  }
  func.func @transform_0(%arg0: i32) -> (i32, i32, i32) {
    %c0_i32 = arith.constant 0 : i32
    %c0_i32_0 = arith.constant 0 : i32
    %c0_i32_1 = arith.constant 0 : i32
    return %arg0, %c0_i32, %c0_i32_0 : i32, i32, i32
  }
  func.func @transform_1(%arg0: i32) -> (i32, i32, i32) {
    %c0_i32 = arith.constant 0 : i32
    %c0_i32_0 = arith.constant 0 : i32
    %c0_i32_1 = arith.constant 0 : i32
    %c0_i32_2 = arith.constant 0 : i32
    return %c0_i32, %c0_i32_0, %c0_i32_1 : i32, i32, i32
  }
  func.func @transform_2(%arg0: i32) -> (i32, i32) {
    %c0_i32 = arith.constant 0 : i32
    %c0_i32_0 = arith.constant 0 : i32
    %c0_i32_1 = arith.constant 0 : i32
    return %c0_i32, %c0_i32_0 : i32, i32
  }
  func.func @transform_3(%arg0: i32) -> (i32, i32) {
    %c0_i32 = arith.constant 0 : i32
    %c0_i32_0 = arith.constant 0 : i32
    %c0_i32_1 = arith.constant 0 : i32
    return %c0_i32, %c0_i32_0 : i32, i32
  }
  func.func @transform_4(%arg0: i32) -> (i32, i32, i32) {
    %c0_i32 = arith.constant 0 : i32
    %c0_i32_0 = arith.constant 0 : i32
    %c0_i32_1 = arith.constant 0 : i32
    %c0_i32_2 = arith.constant 0 : i32
    return %c0_i32, %c0_i32_0, %c0_i32_1 : i32, i32, i32
  }
  func.func @transform_5(%arg0: i32) -> (i32, i32) {
    %c0_i32 = arith.constant 0 : i32
    %c0_i32_0 = arith.constant 0 : i32
    %c0_i32_1 = arith.constant 0 : i32
    return %c0_i32, %c0_i32_0 : i32, i32
  }
  func.func @transform_6(%arg0: i32) -> (i32, i32) {
    %c0_i32 = arith.constant 0 : i32
    %c0_i32_0 = arith.constant 0 : i32
    %c0_i32_1 = arith.constant 0 : i32
    return %c0_i32, %c0_i32_0 : i32, i32
  }
  func.func @transform_7(%arg0: i32) -> (i32, i32) {
    %c0_i32 = arith.constant 0 : i32
    %c0_i32_0 = arith.constant 0 : i32
    %c0_i32_1 = arith.constant 0 : i32
    return %c0_i32, %c0_i32_0 : i32, i32
  }
  func.func @transform_8(%arg0: i32) -> (i32, i32, i32) {
    %c0_i32 = arith.constant 0 : i32
    %c0_i32_0 = arith.constant 0 : i32
    %c0_i32_1 = arith.constant 0 : i32
    return %arg0, %c0_i32, %c0_i32_0 : i32, i32, i32
  }
}

</mosaic_0001>

<bundles_post_ra>
// kernel: tpu_custom_call.1
= control target key start
LH: loop header
LB: loop body
LE: loop exit
PB: predicated region body
PF: predicated region fallthrough
CT: control target
= control target key end

     0   :  { %13 = vsyncpa [#allocation3], 0  ;;  %s1458_s0 = inlined_call_operand.hbm [shape: f32[2,32,256], index: 0, kind: input, shape index: {}]   ;;  %s1459_s1 = inlined_call_operand.vmem [shape: f32[9,1,512], index: 1, kind: input, shape index: {}]   ;;  %s1460_s2 = inlined_call_operand.vmem [shape: f32[8,32], index: 2, kind: input, shape index: {}]   ;;  %s1461_s3 = inlined_call_operand.vmem [shape: f32[8,1], index: 3, kind: input, shape index: {}]   ;;  %s1462_s4 = inlined_call_operand.vmem [shape: f32[3,8,24], index: 4, kind: input, shape index: {}]   ;;  %s1463_s5 = inlined_call_operand.vmem [shape: f32[8,1], index: 5, kind: input, shape index: {}]   ;;  %s1464_s6 = inlined_call_operand.vmem [shape: f32[32,8], index: 6, kind: input, shape index: {}]   ;;  %s1465_s7 = inlined_call_operand.vmem [shape: f32[32,1], index: 7, kind: input, shape index: {}]   ;;  %s1466_s8 = inlined_call_operand.hbm [shape: f32[2,32,256], index: 8, kind: output, shape index: {}]  }
   0x1   :  { %14 = vsyncpa [#allocation4], 0  ;;  %s19_s29 = sshll.u32 %s1458_s0, 4  ;;  %s989_s30 = smov [#allocation2]   ;;  %s20_s29 = int_to_ptr.hbm [resolvable:$true] %s19_s29 }
   0x2   :  { %s21_s9 = sshll.u32 %s989_s30, 4  ;;  %s990_s10 = smov 256   ;;  %s22_s9 = int_to_ptr.vmem [resolvable:$true] %s21_s9 }
   0x3   :  { %s991_s11 = smov 16  }
   0x4   :  { %27 = dma.hbm_to_vmem [thread:$0]  %s20_s29, 2048, %s22_s9, [#allocation3], %s990_s10, %s990_s10, %s991_s11  }
   0x5   :  { %985 = dma.done.wait [#allocation3], 2048  }
   0x6   :  { %986 = vsyncadd [#allocation3], 4294965248  ;;  %v992_v0 = vmov 0   ;;  %v1052_v1 = vld [vmem:[#allocation2 + $0x30] sm:$0xff]  ;;  %v1054_v2 = vld [vmem:[#allocation2 + $0x38] sm:$0xff]  ;;  %vm70_vm0 = vcmask 261120   ;;  %v166_v42 = vlaneseq }
   0x7   :  { %934 = vset.pattern.permute.xlu0 %v992_v0  ;;  %935 = vset.pattern.permute.xlu1 %v992_v0  ;;  %v1056_v3 = vld [vmem:[#allocation2 + $0x70] sm:$0xff]  ;;  %v1060_v4 = vld [vmem:[#allocation2 + $0x78] sm:$0xff]  ;;  %v1062_v5 = vld [vmem:[#allocation2 + $0x20] sm:$0xff]  ;;  %s994_s15 = smov 1   ;;  %s996_s16 = smov 111   ;;  %vm302_vm3 = vcmask 195584  }
   0x8   :  { %936 = vset.pattern.permute.xlu2 %v992_v0  ;;  %86 = vmatpush.msra.mxu0 %v1052_v1  ;;  %v1064_v6 = vld [vmem:[#allocation2 + $0x28] sm:$0xff]  ;;  %v1068_v7 = vld [vmem:[#allocation2 + $0x60] sm:$0xff]  ;;  %v1072_v9 = vld [vmem:[#allocation2 + $0x10] sm:$0xff]  ;;  %s997_s17 = smov 17   ;;  %s998_s18 = smov 112   ;;  %v1185_v47 = vand.u32 127, %v166_v42 }
   0x9   :  { %106 = vmatpush.msra.mxu1 %v1054_v2  ;;  %126 = vmatpush.msra.mxu2 %v1056_v3  ;;  %v1070_v8 = vld [vmem:[#allocation2 + $0x68] sm:$0xff]  ;;  %v1076_v10 = vld [vmem:[#allocation2 + $0x18] sm:$0xff]  ;;  %v1078_v11 = vld [vmem:[#allocation2 + $0x50] sm:$0xff]  ;;  %s999_s19 = smov 113   ;;  %vm684_vm10 = vcmask 64512   ;;  %s868_s14 = sshll.u32 %s1466_s8, 4  ;;  %s869_s14 = int_to_ptr.hbm [resolvable:$true] %s868_s14 }
   0xa   :  { %146 = vmatpush.msra.mxu3 %v1060_v4  ;;  %87 = vmatpush.msra.mxu0 %v1062_v5  ;;  %v1080_v12 = vld [vmem:[#allocation2 + $0x58] sm:$0xff]  ;;  %v1084_v13 = vld [vmem:[#allocation2] sm:$0xff]  ;;  %v1086_v14 = vld [vmem:[#allocation2 + $0x8] sm:$0xff]  ;;  %vm280_vm1 = vcmp.lt.s32.totalorder %v1185_v47, 127  ;;  %vm252_vm2 = vcmp.lt.s32.totalorder %v1185_v47, 1  ;;  %vm223_vm4 = vcmp.lt.s32.totalorder %v1185_v47, 15 }
   0xb   :  { %107 = vmatpush.msra.mxu1 %v1064_v6  ;;  %127 = vmatpush.msra.mxu2 %v1068_v7  ;;  %v1090_v15 = vld [vmem:[#allocation2 + $0x40] sm:$0xff]  ;;  %v1092_v16 = vld [vmem:[#allocation2 + $0x48] sm:$0xff]  ;;  %v662_v33 = vld [vmem:[%s1465_s7 + $0x10] sm:$0xff]  ;;  %vm195_vm5 = vcmp.lt.s32.totalorder %v1185_v47, 16  ;;  %vm168_vm6 = vcmp.lt.s32.totalorder %v1185_v47, 17  ;;  %vm533_vm7 = vcmp.lt.s32.totalorder %v1185_v47, 111 }
   0xc   :  { %147 = vmatpush.msra.mxu3 %v1070_v8  ;;  %88 = vmatpush.msra.mxu0 %v1072_v9  ;;  %v63_v17 = vld [vmem:[%s1460_s2] sm:$0xff]  ;;  %s993_s2 = smov 15   ;;  %v888_v46 = vld [vmem:[%s1459_s1 + $0x14] sm:$0xf]  ;;  %v1196_v54 = vld [vmem:[%s1459_s1 + $0xc] sm:$0xf] }
   0xd   :  { %108 = vmatpush.msra.mxu1 %v1076_v10  ;;  %128 = vmatpush.msra.mxu2 %v1078_v11  ;;  %v64_v18 = vld [vmem:[%s1461_s3] sm:$0xff]  ;;  %s995_s3 = smov 127   ;;  %v288_v48 = vperm.slane %v888_v46, 0  ;;  %v260_v55 = vperm.slane %v1196_v54, 0  ;;  %v1207_v60 = vld [vmem:[%s1462_s4 + $0x8] sm:$0xff]  ;;  %v289_v63 = vperm.slane %v888_v46, 1 }
   0xe   :  { %148 = vmatpush.msra.mxu3 %v1080_v12  ;;  %89 = vmatpush.msra.mxu0 %v1084_v13  ;;  %v642_v32 = vld [vmem:[%s1463_s5] sm:$0xff]  ;;  %v1212_v61 = vld [vmem:[%s1459_s1 + $0x8] sm:$0xf]  ;;  %vm505_vm8 = vcmp.lt.s32.totalorder %v1185_v47, 112  ;;  %vm477_vm9 = vcmp.lt.s32.totalorder %v1185_v47, 113 }
   0xf   :  { %109 = vmatpush.msra.mxu1 %v1086_v14  ;;  %129 = vmatpush.msra.mxu2 %v1090_v15  ;;  %v231_v0 = vperm.slane %v1212_v61, 0 }
  0x10   :  { %149 = vmatpush.msra.mxu3 %v1092_v16  ;;  %881 = vmatmul.msk.f32.vlgmr.msra.gmra.mxu0 %vm70_vm0, %v63_v17 }
  0x11   :  { %882 = vmatmul.msk.f32.vlgmr.msra.gmra.mxu1 %vm70_vm0, %v63_v17  ;;  %883 = vmatmul.msk.f32.vlgmr.msra.gmra.mxu2 %vm70_vm0, %v63_v17 }
  0x12   :  { %884 = vmatmul.msk.f32.vlgmr.msra.gmra.mxu3 %vm70_vm0, %v63_v17  ;;  %67 = vperm.xlu0 %934, %v64_v18  }
  0x84   :  { %v68_v19 = vpop.permute.xlu0 %67 }
  0x8d   :  { %v91_v20 = vpop.f32.mrf.mxu0 }
  0x8e   :  { %v111_v21 = vpop.f32.mrf.mxu1  ;;  %v92_v22 = vadd.f32 %v91_v20, %v68_v19 }
  0x8f   :  { %v112_v23 = vadd.f32 %v111_v21, %v68_v19 }
  0x90   :  { %v1106_v24 = vmax.f32 %v92_v22, 0.0  ;;  %v261_v22 = vperm.slane %v1196_v54, 1 }
  0x91   :  { %v1108_v25 = vmax.f32 %v112_v23, 0.0 }
  0x92   :  { %272 = vrot.lane.b32.xlu0 %v1106_v24, %s995_s3 }
  0x93   :  { %217 = vrot.lane.b32.xlu1 %v1108_v25, %s993_s2  ;;  %246 = vrot.lane.b32.xlu2 %v1108_v25, %s994_s15 }
  0x94   :  { %v131_v26 = vpop.f32.mrf.mxu2 }
  0x95   :  { %v132_v27 = vadd.f32 %v131_v26, %v68_v19  ;;  %v151_v29 = vpop.f32.mrf.mxu3 }
  0x96   :  { %v152_v30 = vadd.f32 %v151_v29, %v68_v19 }
  0x97   :  { %v1119_v28 = vmax.f32 %v132_v27, 0.0 }
  0x98   :  { %v1129_v31 = vmax.f32 %v152_v30, 0.0  ;;  %v290_v30 = vperm.slane %v888_v46, 2 }
  0x9a   :  { %525 = vrot.lane.b32.xlu0 %v1106_v24, %s996_s16 }
  0x9b   :  { %189 = vrot.lane.b32.xlu1 %v1108_v25, %s991_s11  ;;  %244 = vrot.lane.b32.xlu2 %v1106_v24, %s994_s15 }
  0xa2   :  { %497 = vrot.lane.b32.xlu0 %v1106_v24, %s998_s18 }
  0xa3   :  { %160 = vrot.lane.b32.xlu1 %v1108_v25, %s997_s17  ;;  %248 = vrot.lane.b32.xlu2 %v1119_v28, %s994_s15 }
  0xaa   :  { %215 = vrot.lane.b32.xlu0 %v1106_v24, %s993_s2 }
  0xab   :  { %274 = vrot.lane.b32.xlu1 %v1108_v25, %s995_s3  ;;  %219 = vrot.lane.b32.xlu2 %v1119_v28, %s993_s2 }
  0xb2   :  { %250 = vrot.lane.b32.xlu0 %v1129_v31, %s994_s15 }
  0xb3   :  { %469 = vrot.lane.b32.xlu1 %v1106_v24, %s999_s19  ;;  %191 = vrot.lane.b32.xlu2 %v1119_v28, %s991_s11 }
  0xba   :  { %221 = vrot.lane.b32.xlu0 %v1129_v31, %s993_s2 }
  0xbb   :  { %276 = vrot.lane.b32.xlu1 %v1119_v28, %s995_s3  ;;  %162 = vrot.lane.b32.xlu2 %v1119_v28, %s997_s17 }
  0xc2   :  { %193 = vrot.lane.b32.xlu0 %v1129_v31, %s991_s11 }
  0xc3   :  { %278 = vrot.lane.b32.xlu1 %v1129_v31, %s995_s3  ;;  %531 = vrot.lane.b32.xlu2 %v1129_v31, %s996_s16 }
  0xca   :  { %164 = vrot.lane.b32.xlu0 %v1129_v31, %s997_s17 }
  0xcb   :  { %529 = vrot.lane.b32.xlu1 %v1119_v28, %s996_s16  ;;  %503 = vrot.lane.b32.xlu2 %v1129_v31, %s998_s18 }
  0xd2   :  { %475 = vrot.lane.b32.xlu0 %v1129_v31, %s999_s19 }
  0xd3   :  { %501 = vrot.lane.b32.xlu1 %v1119_v28, %s998_s18  ;;  %473 = vrot.lane.b32.xlu2 %v1119_v28, %s999_s19 }
  0xda   :  { %527 = vrot.lane.b32.xlu0 %v1108_v25, %s996_s16 }
  0xdb   :  { %187 = vrot.lane.b32.xlu1 %v1106_v24, %s991_s11  ;;  %158 = vrot.lane.b32.xlu2 %v1106_v24, %s997_s17 }
  0xe2   :  { %645 = vperm.xlu0 %934, %v642_v32   ;;  %v291_v32 = vperm.slane %v888_v46, 3 }
  0xe3   :  { %499 = vrot.lane.b32.xlu1 %v1108_v25, %s998_s18  ;;  %471 = vrot.lane.b32.xlu2 %v1108_v25, %s999_s19 }
  0xea   :  { %676 = vperm.xlu0 %934, %v662_v33  }
  0xed   :  { %v1164_v34 = vpop.permute.xlu2 %246 }
  0xf5   :  { %v245_v35 = vpop.permute.xlu2 %244 }
  0xf6   :  { %v255_v23 = vsel %vm252_vm2, %v245_v35, %v1164_v34 }
  0xf7   :  { %v269_v29 = vmul.f32 %v261_v22, %v255_v23  ;;  %v1303_v23 = vld [vmem:[%s1459_s1 + $0x1c] sm:$0xf] }
  0xfd   :  { %v1166_v36 = vpop.permute.xlu2 %248 }
 0x104   :  { %v273_v38 = vpop.permute.xlu0 %272 }
 0x105   :  { %v1168_v37 = vpop.permute.xlu1 %217  ;;  %v1170_v39 = vpop.permute.xlu2 %219 }
 0x10c   :  { %v1174_v41 = vpop.permute.xlu0 %525 }
 0x10d   :  { %v1172_v40 = vpop.permute.xlu1 %189  ;;  %v1180_v45 = vpop.permute.xlu2 %191 }
 0x114   :  { %v1178_v44 = vpop.permute.xlu0 %497 }
 0x115   :  { %v1176_v43 = vpop.permute.xlu1 %160  ;;  %v1190_v53 = vpop.permute.xlu2 %162 }
 0x11c   :  { %v216_v51 = vpop.permute.xlu0 %215 }
 0x11d   :  { %v275_v49 = vpop.permute.xlu1 %274  ;;  %v1214_v62 = vpop.permute.xlu2 %531  ;;  %v226_v27 = vsel %vm223_vm4, %v216_v51, %v1168_v37 }
 0x11e   :  { %v283_v50 = vsel %vm280_vm1, %v273_v38, %v275_v49 }
 0x11f   :  { %v296_v52 = vmul.f32 %v288_v48, %v283_v50 }
 0x121   :  { %319 = vmatpush.msrb.mxu0 %v296_v52  ;;  %v262_v52 = vperm.slane %v1196_v54, 2 }
 0x123   :  { %320 = vmatpush.msrb.mxu0 %v1106_v24  ;;  %v232_v24 = vperm.slane %v1212_v61, 1 }
 0x124   :  { %v251_v57 = vpop.permute.xlu0 %250 }
 0x125   :  { %v1199_v56 = vpop.permute.xlu1 %469  ;;  %v256_v58 = vsel %vm252_vm2, %v251_v57, %v245_v35  ;;  %v240_v33 = vmul.f32 %v232_v24, %v226_v27  ;;  %v1233_v42 = vpop.permute.xlu2 %503 }
 0x126   :  { %v268_v59 = vmul.f32 %v260_v55, %v256_v58  ;;  %v263_v55 = vperm.slane %v1196_v54, 3  ;;  %v253_v58 = vsel %vm252_vm2, %v1166_v36, %v251_v57  ;;  %v225_v54 = vsel %vm223_vm4, %v1168_v37, %v1170_v39  ;;  %v1274_v57 = vld [vmem:[%s1459_s1 + $0x20] sm:$0xf] }
 0x128   :  { %321 = vmatpush.msrb.mxu0 %v268_v59  ;;  %v233_v59 = vperm.slane %v1212_v61, 2 }
 0x129   :  { %890 = vmatmul.msk.f32.vlgmr.msrb.gmra.mxu0 %vm302_vm3, %v1207_v60 }
 0x12c   :  { %v222_v19 = vpop.permute.xlu0 %221 }
 0x12d   :  { %v277_v17 = vpop.permute.xlu1 %276  ;;  %v227_v20 = vsel %vm223_vm4, %v222_v19, %v216_v51  ;;  %v224_v37 = vsel %vm223_vm4, %v1170_v39, %v222_v19  ;;  %v170_v39 = vsel %vm168_vm6, %v1176_v43, %v1190_v53  ;;  %v544_v19 = vperm.slane %v1274_v57, 3 }
 0x12e   :  { %v282_v18 = vsel %vm280_vm1, %v275_v49, %v277_v17  ;;  %v239_v26 = vmul.f32 %v231_v0, %v227_v20 }
 0x12f   :  { %v297_v21 = vmul.f32 %v289_v63, %v282_v18 }
 0x130   :  { %402 = vmatpush.msra.mxu0 %v239_v26  ;;  %v543_v26 = vperm.slane %v1274_v57, 2 }
 0x131   :  { %339 = vmatpush.msrb.mxu1 %v297_v21  ;;  %v241_v21 = vmul.f32 %v233_v59, %v225_v54 }
 0x133   :  { %340 = vmatpush.msrb.mxu1 %v1108_v25  ;;  %v1244_v25 = vld [vmem:[%s1459_s1 + $0x4] sm:$0xf] }
 0x134   :  { %v1239_v50 = vpop.permute.xlu0 %193  ;;  %v205_v63 = vperm.slane %v1244_v25, 2  ;;  %v206_v18 = vperm.slane %v1244_v25, 3 }
 0x135   :  { %v279_v48 = vpop.permute.xlu1 %278  ;;  %341 = vmatpush.msrb.mxu1 %v269_v29  ;;  %v1311_v29 = vpop.permute.xlu2 %473 }
 0x136   :  { %v281_v35 = vsel %vm280_vm1, %v277_v17, %v279_v48  ;;  %v284_v49 = vsel %vm280_vm1, %v279_v48, %v273_v38  ;;  %891 = vmatmul.msk.f32.vlgmr.msrb.gmra.mxu1 %vm302_vm3, %v1207_v60  ;;  %v254_v38 = vsel %vm252_vm2, %v1164_v34, %v1166_v36  ;;  %v1267_v34 = vld [vmem:[%s1459_s1] sm:$0xf]  ;;  %v234_v36 = vperm.slane %v1212_v61, 3 }
 0x137   :  { %422 = vmatpush.msra.mxu1 %v240_v33  ;;  %v298_v46 = vmul.f32 %v290_v30, %v281_v35  ;;  %v299_v51 = vmul.f32 %v291_v32, %v284_v49  ;;  %v270_v0 = vmul.f32 %v262_v52, %v254_v38  ;;  %v271_v17 = vmul.f32 %v263_v55, %v253_v58  ;;  %v1332_v52 = vld [vmem:[%s1459_s1 + $0x18] sm:$0xf]  ;;  %v243_v55 = vld [vmem:[%s1462_s4] sm:$0xff] }
 0x138   :  { %v197_v61 = vsel %vm195_vm5, %v1172_v40, %v1180_v45  ;;  %v178_v20 = vperm.slane %v1267_v34, 3  ;;  %v177_v22 = vperm.slane %v1267_v34, 2  ;;  %v242_v24 = vmul.f32 %v234_v36, %v224_v37 }
 0x139   :  { %359 = vmatpush.msrb.mxu2 %v298_v46  ;;  %379 = vmatpush.msrb.mxu3 %v299_v51  ;;  %v213_v27 = vmul.f32 %v205_v63, %v197_v61  ;;  %v516_v49 = vperm.slane %v1303_v23, 3  ;;  %v509_v46 = vsel %vm505_vm8, %v1233_v42, %v1178_v44  ;;  %v488_v38 = vperm.slane %v1332_v52, 3 }
 0x13a   :  { %v185_v35 = vmul.f32 %v177_v22, %v170_v39  ;;  %v487_v54 = vperm.slane %v1332_v52, 2  ;;  %v901_v22 = vld [vmem:[%s1462_s4 + $0x10] sm:$0xff] }
 0x13b   :  { %360 = vmatpush.msrb.mxu2 %v1119_v28  ;;  %380 = vmatpush.msrb.mxu3 %v1129_v31  ;;  %v196_v28 = vsel %vm195_vm5, %v1180_v45, %v1239_v50  ;;  %v524_v58 = vmul.f32 %v516_v49, %v509_v46  ;;  %v513_v46 = vperm.slane %v1303_v23, 0 }
 0x13c   :  { %v165_v45 = vpop.permute.xlu0 %164  ;;  %v214_v33 = vmul.f32 %v206_v18, %v196_v28  ;;  %v176_v28 = vperm.slane %v1267_v34, 1 }
 0x13d   :  { %v1293_v31 = vpop.permute.xlu1 %529  ;;  %361 = vmatpush.msrb.mxu2 %v270_v0  ;;  %381 = vmatpush.msrb.mxu3 %v271_v17  ;;  %v169_v32 = vsel %vm168_vm6, %v1190_v53, %v165_v45  ;;  %v159_v18 = vpop.permute.xlu2 %158 }
 0x13e   :  { %892 = vmatmul.msk.f32.vlgmr.msrb.gmra.mxu2 %vm302_vm3, %v1207_v60  ;;  %893 = vmatmul.msk.f32.vlgmr.msrb.gmra.mxu3 %vm302_vm3, %v1207_v60  ;;  %v534_v30 = vsel %vm533_vm7, %v1293_v31, %v1214_v62  ;;  %v537_v60 = vsel %vm533_vm7, %v1214_v62, %v1174_v41  ;;  %v186_v48 = vmul.f32 %v178_v20, %v169_v32  ;;  %v515_v62 = vperm.slane %v1303_v23, 2 }
 0x13f   :  { %442 = vmatpush.msra.mxu2 %v241_v21  ;;  %462 = vmatpush.msra.mxu3 %v242_v24  ;;  %v551_v51 = vmul.f32 %v543_v26, %v534_v30  ;;  %v552_v53 = vmul.f32 %v544_v19, %v537_v60  ;;  %v204_v21 = vperm.slane %v1244_v25, 1  ;;  %v171_v39 = vsel %vm168_vm6, %v159_v18, %v1176_v43 }
 0x140   :  { %v175_v19 = vperm.slane %v1267_v34, 0  ;;  %v172_v26 = vsel %vm168_vm6, %v165_v45, %v159_v18  ;;  %v541_v34 = vperm.slane %v1274_v57, 0  ;;  %v542_v60 = vperm.slane %v1274_v57, 1 }
 0x141   :  { %443 = vmatpush.msra.mxu2 %v213_v27  ;;  %463 = vmatpush.msra.mxu3 %v214_v33  ;;  %v514_v57 = vperm.slane %v1303_v23, 1 }
 0x142   :  { %v183_v33 = vmul.f32 %v175_v19, %v172_v26  ;;  %v656_v26 = vld [vmem:[%s1464_s6] sm:$0xff] }
 0x143   :  { %444 = vmatpush.msra.mxu2 %v185_v35  ;;  %464 = vmatpush.msra.mxu3 %v186_v48 }
 0x144   :  { %v476_v36 = vpop.permute.xlu0 %475 }
 0x145   :  { %611 = vmatpush.msrb.mxu2 %v551_v51  ;;  %631 = vmatpush.msrb.mxu3 %v552_v53  ;;  %v502_v59 = vpop.permute.xlu1 %501  ;;  %v478_v0 = vsel %vm477_vm9, %v1311_v29, %v476_v36  ;;  %v481_v17 = vsel %vm477_vm9, %v476_v36, %v1199_v56  ;;  %v472_v48 = vpop.permute.xlu2 %471 }
 0x146   :  { %v506_v63 = vsel %vm505_vm8, %v502_v59, %v1233_v42  ;;  %896 = vmatmul.msk.f32.vlgmr.msra.gmra.mxu2 %vm302_vm3, %v243_v55  ;;  %897 = vmatmul.msk.f32.vlgmr.msra.gmra.mxu3 %vm302_vm3, %v243_v55  ;;  %v496_v61 = vmul.f32 %v488_v38, %v481_v17  ;;  %v495_v20 = vmul.f32 %v487_v54, %v478_v0  ;;  %v203_v42 = vperm.slane %v1244_v25, 0 }
 0x147   :  { %v523_v37 = vmul.f32 %v515_v62, %v506_v63  ;;  %632 = vmatpush.msrb.mxu3 %v524_v58  ;;  %v479_v53 = vsel %vm477_vm9, %v472_v48, %v1311_v29  ;;  %v480_v62 = vsel %vm477_vm9, %v1199_v56, %v472_v48 }
 0x149   :  { %612 = vmatpush.msrb.mxu2 %v523_v37  ;;  %633 = vmatpush.msrb.mxu3 %v496_v61 }
 0x14b   :  { %613 = vmatpush.msrb.mxu2 %v495_v20 }
 0x14c   :  { %v528_v30 = vpop.permute.xlu0 %527 }
 0x14d   :  { %v188_v24 = vpop.permute.xlu1 %187  ;;  %v535_v45 = vsel %vm533_vm7, %v528_v30, %v1293_v31  ;;  %v485_v31 = vperm.slane %v1332_v52, 0 }
 0x14e   :  { %v198_v25 = vsel %vm195_vm5, %v188_v24, %v1172_v40  ;;  %v199_v27 = vsel %vm195_vm5, %v1239_v50, %v188_v24  ;;  %904 = vmatmul.msk.f32.vlgmr.msrb.gmra.mxu2 %vm302_vm3, %v901_v22  ;;  %905 = vmatmul.msk.f32.vlgmr.msrb.gmra.mxu3 %vm302_vm3, %v901_v22  ;;  %v536_v40 = vsel %vm533_vm7, %v1174_v41, %v528_v30  ;;  %v486_v41 = vperm.slane %v1332_v52, 1 }
 0x14f   :  { %v211_v43 = vmul.f32 %v203_v42, %v199_v27  ;;  %v212_v32 = vmul.f32 %v204_v21, %v198_v25  ;;  %v184_v50 = vmul.f32 %v176_v28, %v171_v39  ;;  %v549_v35 = vmul.f32 %v541_v34, %v536_v40  ;;  %v661_v34 = vld [vmem:[%s1465_s7 + $0x8] sm:$0xff] }
 0x150   :  { %v550_v49 = vmul.f32 %v542_v60, %v535_v45  ;;  %v493_v58 = vmul.f32 %v485_v31, %v480_v62  ;;  %v494_v54 = vmul.f32 %v486_v41, %v479_v53  ;;  %671 = vperm.xlu2 %936, %v661_v34  }
 0x151   :  { %403 = vmatpush.msra.mxu0 %v211_v43  ;;  %423 = vmatpush.msra.mxu1 %v212_v32  ;;  %v663_v32 = vld [vmem:[%s1465_s7 + $0x18] sm:$0xff] }
 0x153   :  { %404 = vmatpush.msra.mxu0 %v183_v33  ;;  %424 = vmatpush.msra.mxu1 %v184_v50 }
 0x154   :  { %894 = vmatmul.msk.f32.vlgmr.msra.gmra.mxu0 %vm302_vm3, %v243_v55  ;;  %895 = vmatmul.msk.f32.vlgmr.msra.gmra.mxu1 %vm302_vm3, %v243_v55 }
 0x155   :  { %571 = vmatpush.msrb.mxu0 %v549_v35  ;;  %591 = vmatpush.msrb.mxu1 %v550_v49  ;;  %v500_v51 = vpop.permute.xlu1 %499  ;;  %v657_v35 = vld [vmem:[%s1464_s6 + $0x8] sm:$0xff]  ;;  %v658_v49 = vld [vmem:[%s1464_s6 + $0x10] sm:$0xff] }
 0x156   :  { %v507_v23 = vsel %vm505_vm8, %v500_v51, %v502_v59  ;;  %v508_v55 = vsel %vm505_vm8, %v1178_v44, %v500_v51  ;;  %v660_v44 = vld [vmem:[%s1465_s7] sm:$0xff] }
 0x157   :  { %v521_v38 = vmul.f32 %v513_v46, %v508_v55  ;;  %v522_v52 = vmul.f32 %v514_v57, %v507_v23  ;;  %666 = vperm.xlu1 %935, %v660_v44   ;;  %v659_v46 = vld [vmem:[%s1464_s6 + $0x18] sm:$0xff]  ;;  %s1000_s6 = smov [#allocation5]  }
 0x158   :  { %s866_s0 = sshll.u32 %s1000_s6, 4  ;;  %s867_s0 = int_to_ptr.vmem [resolvable:$true] %s866_s0 }
 0x159   :  { %572 = vmatpush.msrb.mxu0 %v521_v38  ;;  %592 = vmatpush.msrb.mxu1 %v522_v52 }
 0x15b   :  { %573 = vmatpush.msrb.mxu0 %v493_v58  ;;  %593 = vmatpush.msrb.mxu1 %v494_v54 }
 0x15c   :  { %902 = vmatmul.msk.f32.vlgmr.msrb.gmra.mxu0 %vm302_vm3, %v901_v22  ;;  %903 = vmatmul.msk.f32.vlgmr.msrb.gmra.mxu1 %vm302_vm3, %v901_v22  ;;  %v646_v22 = vpop.permute.xlu0 %645 }
 0x15f   :  { %681 = vperm.xlu1 %935, %v663_v32  }
 0x1a6   :  { %v323_v63 = vpop.f32.mrf.mxu0 }
 0x1b3   :  { %v343_v59 = vpop.f32.mrf.mxu1 }
 0x1c1   :  { %v363_v56 = vpop.f32.mrf.mxu2  ;;  %v383_v29 = vpop.f32.mrf.mxu3 }
 0x1c9   :  { %v446_v36 = vpop.f32.mrf.mxu2  ;;  %v466_v37 = vpop.f32.mrf.mxu3 }
 0x1ca   :  { %v447_v47 = vadd.f32 %v446_v36, %v363_v56  ;;  %v467_v0 = vadd.f32 %v466_v37, %v383_v29  ;;  %v667_v57 = vpop.permute.xlu1 %666  ;;  %v672_v37 = vpop.permute.xlu2 %671 }
 0x1d1   :  { %v406_v17 = vpop.f32.mrf.mxu0  ;;  %v426_v61 = vpop.f32.mrf.mxu1 }
 0x1d2   :  { %v615_v18 = vpop.f32.mrf.mxu2  ;;  %v635_v20 = vpop.f32.mrf.mxu3  ;;  %v407_v25 = vadd.f32 %v406_v17, %v323_v63  ;;  %v427_v27 = vadd.f32 %v426_v61, %v343_v59 }
 0x1d3   :  { %v640_v42 = vadd.f32 %v615_v18, %v447_v47  ;;  %v641_v21 = vadd.f32 %v635_v20, %v467_v0 }
 0x1d5   :  { %v650_v28 = vadd.f32 %v646_v22, %v640_v42  ;;  %v651_v39 = vadd.f32 %v646_v22, %v641_v21 }
 0x1d7   :  { %v654_v19 = vmax.f32 %v650_v28, 0.0  ;;  %v655_v24 = vmax.f32 %v651_v39, 0.0 }
 0x1d9   :  { %770 = vmatpush.msra.mxu2 %v654_v19  ;;  %799 = vmatpush.msra.mxu3 %v655_v24  ;;  %v575_v30 = vpop.f32.mrf.mxu0  ;;  %v595_v43 = vpop.f32.mrf.mxu1 }
 0x1da   :  { %v638_v60 = vadd.f32 %v575_v30, %v407_v25  ;;  %v639_v45 = vadd.f32 %v595_v43, %v427_v27  ;;  %914 = vmatmul.msk.f32.vlgmr.msra.gmra.mxu2 %vm684_vm10, %v656_v26  ;;  %918 = vmatmul.msk.f32.vlgmr.msra.gmra.mxu3 %vm684_vm10, %v656_v26  ;;  %v677_v19 = vpop.permute.xlu0 %676 }
 0x1dc   :  { %v648_v40 = vadd.f32 %v646_v22, %v638_v60  ;;  %v649_v50 = vadd.f32 %v646_v22, %v639_v45 }
 0x1de   :  { %v652_v33 = vmax.f32 %v648_v40, 0.0  ;;  %v653_v48 = vmax.f32 %v649_v50, 0.0 }
 0x1e0   :  { %712 = vmatpush.msra.mxu0 %v652_v33  ;;  %741 = vmatpush.msra.mxu1 %v653_v48  ;;  %v682_v33 = vpop.permute.xlu1 %681 }
 0x1e1   :  { %906 = vmatmul.msk.f32.vlgmr.msra.gmra.mxu0 %vm684_vm10, %v656_v26  ;;  %910 = vmatmul.msk.f32.vlgmr.msra.gmra.mxu1 %vm684_vm10, %v656_v26 }
 0x1e2   :  { %915 = vmatmul.msk.f32.gmra.mxu2 %vm684_vm10, %v657_v35  ;;  %919 = vmatmul.msk.f32.gmra.mxu3 %vm684_vm10, %v657_v35 }
 0x1e9   :  { %907 = vmatmul.msk.f32.gmra.mxu0 %vm684_vm10, %v657_v35  ;;  %911 = vmatmul.msk.f32.gmra.mxu1 %vm684_vm10, %v657_v35 }
 0x1ea   :  { %916 = vmatmul.msk.f32.gmra.mxu2 %vm684_vm10, %v658_v49  ;;  %920 = vmatmul.msk.f32.gmra.mxu3 %vm684_vm10, %v658_v49 }
 0x1f1   :  { %908 = vmatmul.msk.f32.gmra.mxu0 %vm684_vm10, %v658_v49  ;;  %912 = vmatmul.msk.f32.gmra.mxu1 %vm684_vm10, %v658_v49 }
 0x1f2   :  { %917 = vmatmul.msk.f32.gmra.mxu2 %vm684_vm10, %v659_v46  ;;  %921 = vmatmul.msk.f32.gmra.mxu3 %vm684_vm10, %v659_v46 }
 0x1f9   :  { %909 = vmatmul.msk.f32.gmra.mxu0 %vm684_vm10, %v659_v46  ;;  %913 = vmatmul.msk.f32.gmra.mxu1 %vm684_vm10, %v659_v46 }
 0x25d   :  { %v772_v31 = vpop.f32.mrf.mxu2  ;;  %v801_v41 = vpop.f32.mrf.mxu3 }
 0x25e   :  { %v714_v51 = vpop.f32.mrf.mxu0  ;;  %v743_v53 = vpop.f32.mrf.mxu1  ;;  %v773_v62 = vadd.f32 %v772_v31, %v667_v57  ;;  %v802_v23 = vadd.f32 %v801_v41, %v667_v57 }
 0x25f   :  { %v715_v55 = vadd.f32 %v714_v51, %v667_v57  ;;  %v744_v38 = vadd.f32 %v743_v53, %v667_v57 }
 0x260   :  { %v815_v52 = vadd.f32 %v773_v62, %v1090_v15  ;;  %v816_v58 = vadd.f32 %v802_v23, %v1092_v16 }
 0x261   :  { %v813_v54 = vadd.f32 %v715_v55, %v1084_v13  ;;  %v814_v56 = vadd.f32 %v744_v38, %v1086_v14 }
 0x262   :  { %v831_v29 = vmax.f32 %v815_v52, 0.0  ;;  %v832_v36 = vmax.f32 %v816_v58, 0.0 }
 0x263   :  { %v829_v63 = vmax.f32 %v813_v54, 0.0  ;;  %v830_v59 = vmax.f32 %v814_v56, 0.0 }
 0x264   :  { %854 = vst [vmem:[#allocation5 + $0x40] sm:$0xff] %v831_v29 }
 0x265   :  { %v775_v44 = vpop.f32.mrf.mxu2  ;;  %v804_v47 = vpop.f32.mrf.mxu3  ;;  %845 = vst [vmem:[#allocation5] sm:$0xff] %v829_v63 }
 0x266   :  { %846 = vst [vmem:[#allocation5 + $0x8] sm:$0xff] %v830_v59  ;;  %v717_v0 = vpop.f32.mrf.mxu0  ;;  %v746_v17 = vpop.f32.mrf.mxu1  ;;  %v776_v61 = vadd.f32 %v775_v44, %v672_v37  ;;  %v805_v15 = vadd.f32 %v804_v47, %v672_v37 }
 0x267   :  { %855 = vst [vmem:[#allocation5 + $0x48] sm:$0xff] %v832_v36  ;;  %v718_v16 = vadd.f32 %v717_v0, %v672_v37  ;;  %v747_v18 = vadd.f32 %v746_v17, %v672_v37 }
 0x268   :  { %v819_v13 = vadd.f32 %v776_v61, %v1078_v11  ;;  %v820_v14 = vadd.f32 %v805_v15, %v1080_v12 }
 0x269   :  { %v817_v20 = vadd.f32 %v718_v16, %v1072_v9  ;;  %v818_v42 = vadd.f32 %v747_v18, %v1076_v10 }
 0x26a   :  { %v835_v21 = vmax.f32 %v819_v13, 0.0  ;;  %v836_v39 = vmax.f32 %v820_v14, 0.0 }
 0x26b   :  { %v833_v22 = vmax.f32 %v817_v20, 0.0  ;;  %v834_v28 = vmax.f32 %v818_v42, 0.0 }
 0x26c   :  { %856 = vst [vmem:[#allocation5 + $0x50] sm:$0xff] %v835_v21 }
 0x26d   :  { %v778_v24 = vpop.f32.mrf.mxu2  ;;  %v807_v26 = vpop.f32.mrf.mxu3  ;;  %847 = vst [vmem:[#allocation5 + $0x10] sm:$0xff] %v833_v22 }
 0x26e   :  { %v779_v25 = vadd.f32 %v778_v24, %v677_v19  ;;  %v808_v27 = vadd.f32 %v807_v26, %v677_v19  ;;  %848 = vst [vmem:[#allocation5 + $0x18] sm:$0xff] %v834_v28  ;;  %v720_v30 = vpop.f32.mrf.mxu0  ;;  %v749_v11 = vpop.f32.mrf.mxu1 }
 0x26f   :  { %857 = vst [vmem:[#allocation5 + $0x58] sm:$0xff] %v836_v39  ;;  %v721_v12 = vadd.f32 %v720_v30, %v677_v19  ;;  %v750_v43 = vadd.f32 %v749_v11, %v677_v19 }
 0x270   :  { %v823_v9 = vadd.f32 %v779_v25, %v1068_v7  ;;  %v824_v10 = vadd.f32 %v808_v27, %v1070_v8 }
 0x271   :  { %v821_v32 = vadd.f32 %v721_v12, %v1062_v5  ;;  %v822_v34 = vadd.f32 %v750_v43, %v1064_v6 }
 0x272   :  { %v839_v60 = vmax.f32 %v823_v9, 0.0  ;;  %v840_v45 = vmax.f32 %v824_v10, 0.0 }
 0x273   :  { %v837_v40 = vmax.f32 %v821_v32, 0.0  ;;  %v838_v50 = vmax.f32 %v822_v34, 0.0 }
 0x274   :  { %858 = vst [vmem:[#allocation5 + $0x60] sm:$0xff] %v839_v60 }
 0x275   :  { %859 = vst [vmem:[#allocation5 + $0x68] sm:$0xff] %v840_v45  ;;  %v781_v48 = vpop.f32.mrf.mxu2  ;;  %v810_v35 = vpop.f32.mrf.mxu3 }
 0x276   :  { %849 = vst [vmem:[#allocation5 + $0x20] sm:$0xff] %v837_v40  ;;  %v782_v49 = vadd.f32 %v781_v48, %v682_v33  ;;  %v811_v46 = vadd.f32 %v810_v35, %v682_v33  ;;  %v723_v57 = vpop.f32.mrf.mxu0  ;;  %v752_v7 = vpop.f32.mrf.mxu1 }
 0x277   :  { %850 = vst [vmem:[#allocation5 + $0x28] sm:$0xff] %v838_v50  ;;  %v724_v8 = vadd.f32 %v723_v57, %v682_v33  ;;  %v753_v31 = vadd.f32 %v752_v7, %v682_v33 }
 0x278   :  { %v827_v5 = vadd.f32 %v782_v49, %v1056_v3  ;;  %v828_v6 = vadd.f32 %v811_v46, %v1060_v4 }
 0x279   :  { %v825_v41 = vadd.f32 %v724_v8, %v1052_v1  ;;  %v826_v51 = vadd.f32 %v753_v31, %v1054_v2 }
 0x27a   :  { %v843_v53 = vmax.f32 %v827_v5, 0.0  ;;  %v844_v62 = vmax.f32 %v828_v6, 0.0 }
 0x27b   :  { %v841_v23 = vmax.f32 %v825_v41, 0.0  ;;  %v842_v55 = vmax.f32 %v826_v51, 0.0 }
 0x27c   :  { %860 = vst [vmem:[#allocation5 + $0x70] sm:$0xff] %v843_v53 }
 0x27d   :  { %861 = vst [vmem:[#allocation5 + $0x78] sm:$0xff] %v844_v62 }
 0x27e   :  { %851 = vst [vmem:[#allocation5 + $0x30] sm:$0xff] %v841_v23 }
 0x27f   :  { %852 = vst [vmem:[#allocation5 + $0x38] sm:$0xff] %v842_v55 }
 0x280   :  { %874 = dma.vmem_to_hbm [thread:$0]  %s867_s0, 2048, %s869_s14, [#allocation4], %s990_s10, %s990_s10, %s991_s11  }
 0x281   :  { %987 = dma.done.wait [#allocation4], 2048  }
 0x282   :  { %988 = vsyncadd [#allocation4], 4294965248 }
 0x283   :  { %879 = vsyncpa [#allocation3], 1 }
 0x284   :  { %880 = vsyncpa [#allocation4], 1 }

</bundles_post_ra>
